<compile_context>
chip_gen: v7x
topology: tpu7x:2x2x1
jax: 0.10.0
libtpu: 0.0.40
codegen_flags: <defaults>
</compile_context>

<pallas_src>
import functools
import math

import jax
import jax.numpy as jnp
from jax import lax
from jax.experimental import pallas as pl
from jax.experimental.pallas import tpu as pltpu


_NEG_INF = -1e30          # finite "minus infinity": keeps padded lanes NaN-free
_SLACK = 1.2              # safety factor on all VMEM estimates


# ---------------------------------------------------------------------------
# helpers
# ---------------------------------------------------------------------------

def _round_up(a, b):
    return (a + b - 1) // b * b


def _sublane_multiple(*dtypes):
    # f32 packs 8 rows per vreg, bf16 16, int8/fp8 32.
    m = 8
    for dt in dtypes:
        m = max(m, 32 // max(jnp.dtype(dt).itemsize, 1))
    return m


@functools.lru_cache(maxsize=None)
def _vmem_limit_bytes():
    """Per-chip VMEM limit with headroom (v7x: ~48 MiB, v5e/v6e: ~96 MiB)."""
    phys = 64 << 20                      # conservative default = v7x-sized VMEM
    try:
        info = pltpu.get_tpu_info()
        for attr in ("vmem_capacity_bytes", "vmem_bytes", "vmem_size_bytes"):
            val = getattr(info, attr, None)
            if val:
                phys = int(val)
                break
    except Exception:
        pass
    # leave headroom for compiler scratch / double buffers; never above 100 MiB
    return min(phys * 3 // 4, 100 << 20)


@functools.lru_cache(maxsize=None)
def _single_buffer_supported():
    """One-time tiny probe: does this jax/libtpu accept pl.Buffered(1)?"""
    try:
        def _probe(x_ref, o_ref):
            o_ref[...] = x_ref[...] + 1.0

        out = pl.pallas_call(
            _probe,
            out_shape=jax.ShapeDtypeStruct((8, 128), jnp.float32),
            grid_spec=pltpu.PrefetchScalarGridSpec(
                num_scalar_prefetch=0,
                grid=(1,),
                in_specs=[pl.BlockSpec((8, 128), lambda i: (0, 0),
                                       pipeline_mode=pl.Buffered(1))],
                out_specs=pl.BlockSpec((8, 128), lambda i: (0, 0)),
            ),
        )(jnp.zeros((8, 128), jnp.float32))
        jax.block_until_ready(out)
        return True
    except Exception:
        return False


def _dot_xwT(x_tile, w_tile):
    # (tm, d) x (tv, d) -> (tm, tv) contracting the last dim of both operands
    # == x @ W^T with the PyTorch (vocab, d_model) layout, no HBM transpose,
    # f32 accumulation on the MXU.
    return lax.dot_general(
        x_tile, w_tile,
        dimension_numbers=(((1,), (1,)), ((), ())),
        preferred_element_type=jnp.float32)


# ---------------------------------------------------------------------------
# kernels  (each performs the matmul exactly once per logits tile)
# ---------------------------------------------------------------------------

def _fused_kernel(x_ref, w_ref, b_ref, o_ref):
    # Resident-weight path: full (Vp, d) weight sits in VMEM, 1-D grid over
    # row tiles, full-vocab softmax directly on the logits tile.
    logits = _dot_xwT(x_ref[...], w_ref[...]) + b_ref[...]
    m = jnp.max(logits, axis=-1, keepdims=True)
    shifted = logits - m
    lse = jnp.log(jnp.sum(jnp.exp(shifted), axis=-1, keepdims=True))
    o_ref[...] = (shifted - lse).astype(o_ref.dtype)


def _onepass_kernel(x_ref, w_ref, b_ref, o_ref, m_sc, s_sc):
    # Vocab-streamed single-pass path: the (tm, Vp) output slab is resident in
    # VMEM across the vocab axis (out index_map ignores j).  Each step computes
    # one (tm, tv) logits tile, stores it raw into the slab and folds it into
    # the running max / sum-exp; the last step normalizes the slab in place.
    j = pl.program_id(1)

    @pl.when(j == 0)
    def _():
        m_sc[...] = jnp.full(m_sc.shape, _NEG_INF, dtype=m_sc.dtype)
        s_sc[...] = jnp.zeros(s_sc.shape, dtype=s_sc.dtype)

    tv = w_ref.shape[0]
    logits = _dot_xwT(x_ref[...], w_ref[...]) + b_ref[...]

    m_prev = m_sc[...]
    m_new = jnp.maximum(m_prev, jnp.max(logits, axis=-1, keepdims=True))
    s_sc[...] = (s_sc[...] * jnp.exp(m_prev - m_new)
                 + jnp.sum(jnp.exp(logits - m_new), axis=-1, keepdims=True))
    m_sc[...] = m_new

    col = pl.multiple_of(j * tv, 128)
    o_ref[:, pl.ds(col, tv)] = logits.astype(o_ref.dtype)

    @pl.when(j == pl.num_programs(1) - 1)
    def _():
        lse = m_sc[...] + jnp.log(s_sc[...])
        o_ref[...] = (o_ref[...].astype(jnp.float32) - lse).astype(o_ref.dtype)


def _logits_stats_kernel(x_ref, w_ref, b_ref, logits_ref, lse_ref, m_sc, s_sc):
    # Huge-vocab pass 1: single matmul per tile, raw f32 logits to HBM, running
    # max / sum-exp in scratch, per-row logsumexp emitted on the last step.
    j = pl.program_id(1)

    @pl.when(j == 0)
    def _():
        m_sc[...] = jnp.full(m_sc.shape, _NEG_INF, dtype=m_sc.dtype)
        s_sc[...] = jnp.zeros(s_sc.shape, dtype=s_sc.dtype)

    logits = _dot_xwT(x_ref[...], w_ref[...]) + b_ref[...]
    logits_ref[...] = logits

    m_prev = m_sc[...]
    m_new = jnp.maximum(m_prev, jnp.max(logits, axis=-1, keepdims=True))
    s_sc[...] = (s_sc[...] * jnp.exp(m_prev - m_new)
                 + jnp.sum(jnp.exp(logits - m_new), axis=-1, keepdims=True))
    m_sc[...] = m_new

    @pl.when(j == pl.num_programs(1) - 1)
    def _():
        lse_ref[...] = m_sc[...] + jnp.log(s_sc[...])


def _normalize_kernel(logits_ref, lse_ref, o_ref):
    # Huge-vocab pass 2: pure elementwise, no matmul, no weight re-stream.
    o_ref[...] = (logits_ref[...] - lse_ref[...]).astype(o_ref.dtype)


# ---------------------------------------------------------------------------
# VMEM estimates (include f32 temporaries + 20% slack)
# ---------------------------------------------------------------------------

def _est_resident(tm, Vp, d, xi, wi, oi, w_bufs):
    return int(_SLACK * (w_bufs * Vp * d * wi          # resident weight
                         + 2 * 8 * Vp * 4              # bias (sublane-padded)
                         + 2 * tm * d * xi             # x tile (double-buffered)
                         + 2 * tm * Vp * oi            # output tile
                         + 3 * tm * Vp * 4))           # logits/shifted/exp temps


def _est_onepass(tm, tv, Vp, d, xi, wi, oi):
    return int(_SLACK * (2 * tm * d * xi               # x tile
                         + 2 * tv * d * wi             # streamed weight tile
                         + 2 * 8 * tv * 4              # bias tile
                         + 2 * tm * Vp * oi            # resident output slab
                         + tm * Vp * 4                 # final-normalize temp
                         + 2 * tm * tv * 4             # logits + exp temps
                         + 4 * tm * 128 * 4))          # m/s scratch (lane-padded)


def _est_twopass(tm, tv, d, xi, wi):
    return int(_SLACK * (2 * tm * d * xi
                         + 2 * tv * d * wi
                         + 2 * 8 * tv * 4
                         + 4 * tm * tv * 4             # logits out + exp temp
                         + 6 * tm * 128 * 4))          # lse out + m/s scratch


# ---------------------------------------------------------------------------
# tile selection
# ---------------------------------------------------------------------------

def _row_tile_candidates(M, sub):
    cap = max(_round_up(M, sub), sub)
    cands = {min(cap, max(_round_up(t, sub), sub))
             for t in (1024, 512, 256, 128, 64, 32, 16, 8)}
    return sorted(cands, reverse=True)


def _vocab_tile_candidates(Vp):
    k = Vp // 128
    divs = sorted((128 * f for f in range(1, k + 1) if k % f == 0), reverse=True)
    # Prefer multiples of 256 (full-width N on the v6e/v7x 256x256 MXU).
    return [c for c in divs if c % 256 == 0] + [c for c in divs if c % 256 != 0]


def _pick_streamed_tiles(M, Vp, sub, est_fn, budget):
    row_cands = _row_tile_candidates(M, sub)
    voc_cands = _vocab_tile_candidates(Vp)
    # tm is the weight-stream arithmetic-intensity lever -> prefer it first,
    # but insist on MXU-filling vocab tiles (>=512, then >=256) when possible.
    for tv_min in (min(512, Vp), min(256, Vp), 128):
        for tm in row_cands:
            for tv in voc_cands:
                if tv >= tv_min and est_fn(tm, tv) <= budget:
                    return tm, tv
    return None


# ---------------------------------------------------------------------------
# pallas_call builders
# ---------------------------------------------------------------------------

def _resident_call(x2d, w, b2d, tm, out_dtype, vmem_limit, single_buffer):
    Mp, d = x2d.shape
    Vp = w.shape[0]
    const_kw = dict(pipeline_mode=pl.Buffered(1)) if single_buffer else {}
    return pl.pallas_call(
        _fused_kernel,
        out_shape=jax.ShapeDtypeStruct((Mp, Vp), out_dtype),
        grid_spec=pltpu.PrefetchScalarGridSpec(
            num_scalar_prefetch=0,
            grid=(Mp // tm,),
            in_specs=[pl.BlockSpec((tm, d), lambda i: (i, 0)),
                      pl.BlockSpec((Vp, d), lambda i: (0, 0), **const_kw),
                      pl.BlockSpec((1, Vp), lambda i: (0, 0), **const_kw)],
            out_specs=pl.BlockSpec((tm, Vp), lambda i: (i, 0)),
        ),
        compiler_params=pltpu.CompilerParams(
            dimension_semantics=("parallel",),
            vmem_limit_bytes=vmem_limit),
    )(x2d, w, b2d)


def _onepass_call(x2d, w, b2d, tm, tv, out_dtype, vmem_limit):
    Mp, d = x2d.shape
    Vp = w.shape[0]
    return pl.pallas_call(
        _onepass_kernel,
        out_shape=jax.ShapeDtypeStruct((Mp, Vp), out_dtype),
        grid_spec=pltpu.PrefetchScalarGridSpec(
            num_scalar_prefetch=0,
            grid=(Mp // tm, Vp // tv),
            in_specs=[pl.BlockSpec((tm, d), lambda i, j: (i, 0)),
                      pl.BlockSpec((tv, d), lambda i, j: (j, 0)),
                      pl.BlockSpec((1, tv), lambda i, j: (0, j))],
            # Output slab resident across the (inner, "arbitrary") vocab axis.
            out_specs=pl.BlockSpec((tm, Vp), lambda i, j: (i, 0)),
            scratch_shapes=[pltpu.VMEM((tm, 1), jnp.float32),
                            pltpu.VMEM((tm, 1), jnp.float32)],
        ),
        compiler_params=pltpu.CompilerParams(
            dimension_semantics=("parallel", "arbitrary"),
            vmem_limit_bytes=vmem_limit),
    )(x2d, w, b2d)


def _twopass_call(x2d, w, b2d, tm, tv, out_dtype, vmem_limit):
    Mp, d = x2d.shape
    Vp = w.shape[0]
    grid = (Mp // tm, Vp // tv)

    logits, lse = pl.pallas_call(
        _logits_stats_kernel,
        out_shape=(jax.ShapeDtypeStruct((Mp, Vp), jnp.float32),
                   jax.ShapeDtypeStruct((Mp, 1), jnp.float32)),
        grid_spec=pltpu.PrefetchScalarGridSpec(
            num_scalar_prefetch=0,
            grid=grid,
            in_specs=[pl.BlockSpec((tm, d), lambda i, j: (i, 0)),
                      pl.BlockSpec((tv, d), lambda i, j: (j, 0)),
                      pl.BlockSpec((1, tv), lambda i, j: (0, j))],
            out_specs=(pl.BlockSpec((tm, tv), lambda i, j: (i, j)),
                       pl.BlockSpec((tm, 1), lambda i, j: (i, 0))),
            scratch_shapes=[pltpu.VMEM((tm, 1), jnp.float32),
                            pltpu.VMEM((tm, 1), jnp.float32)],
        ),
        compiler_params=pltpu.CompilerParams(
            dimension_semantics=("parallel", "arbitrary"),
            vmem_limit_bytes=vmem_limit),
    )(x2d, w, b2d)

    # In-place normalize over the cached logits buffer when dtypes match.
    alias = {0: 0} if jnp.dtype(out_dtype) == jnp.dtype(jnp.float32) else {}
    return pl.pallas_call(
        _normalize_kernel,
        out_shape=jax.ShapeDtypeStruct((Mp, Vp), out_dtype),
        grid_spec=pltpu.PrefetchScalarGridSpec(
            num_scalar_prefetch=0,
            grid=grid,
            in_specs=[pl.BlockSpec((tm, tv), lambda i, j: (i, j)),
                      pl.BlockSpec((tm, 1), lambda i, j: (i, 0))],
            out_specs=pl.BlockSpec((tm, tv), lambda i, j: (i, j)),
        ),
        input_output_aliases=alias,
        compiler_params=pltpu.CompilerParams(
            dimension_semantics=("parallel", "parallel"),
            vmem_limit_bytes=vmem_limit),
    )(logits, lse)


# ---------------------------------------------------------------------------
# public wrapper
# ---------------------------------------------------------------------------

def linear_log_softmax(x, weight, bias, *, out_dtype=jnp.float32,
                       row_tile=None, vocab_tile=None, force_path=None):
    """log_softmax(x @ weight.T + bias, axis=-1)   (LinearSoftmaxLayer.forward)

    x:      (B, S, d_model)
    weight: (vocab, d_model)  -- PyTorch nn.Linear layout, never transposed in HBM
    bias:   (vocab,)
    """
    if force_path not in (None, "resident", "onepass", "twopass"):
        raise ValueError(f"unknown force_path={force_path!r}")

    B, S, d = x.shape
    V, d_w = weight.shape
    assert d == d_w, "weight must have shape (vocab, d_model)"
    out_dtype = jnp.dtype(out_dtype)

    xi = jnp.dtype(x.dtype).itemsize
    wi = jnp.dtype(weight.dtype).itemsize
    oi = out_dtype.itemsize
    sub = _sublane_multiple(x.dtype, out_dtype)

    vmem_limit = _vmem_limit_bytes()
    fast_budget = int(vmem_limit * 0.55)
    tile_budget = int(vmem_limit * 0.60)

    # Pad the vocab to a lane multiple: padded weight rows are 0 and padded
    # bias is -1e30, so padded logits never perturb max / sum-exp; sliced off.
    Vp = _round_up(V, 128)
    if Vp != V:
        weight = jnp.pad(weight, ((0, Vp - V), (0, 0)))
        bias = jnp.pad(bias, (0, Vp - V), constant_values=_NEG_INF)
    b2d = bias.astype(jnp.float32).reshape(1, Vp)

    M = B * S
    w_bufs = 1 if _single_buffer_supported() else 2

    def pick_resident():
        cands = ([max(_round_up(int(row_tile), sub), sub)] if row_tile
                 else _row_tile_candidates(M, sub))
        for cand in cands:
            if _est_resident(cand, Vp, d, xi, wi, oi, w_bufs) <= fast_budget:
                return cand
        return None

    def pick_streamed(est_fn):
        if row_tile is not None and vocab_tile is not None:
            tv_ = int(vocab_tile)
            assert tv_ % 128 == 0 and Vp % tv_ == 0, "bad vocab_tile override"
            return max(_round_up(int(row_tile), sub), sub), tv_
        return _pick_streamed_tiles(M, Vp, sub, est_fn, tile_budget)

    # --- path + tile selection ---
    path = force_path
    tm = tv = None
    if path in (None, "resident"):
        tm = pick_resident()
        if tm is not None:
            path = "resident"
        elif path == "resident":
            raise ValueError("resident-weight path does not fit in VMEM")
        else:
            path = None
    if path in (None, "onepass"):
        picked = pick_streamed(
            lambda a, b: _est_onepass(a, b, Vp, d, xi, wi, oi))
        if picked is not None:
            tm, tv = picked
            path = "onepass"
        elif path == "onepass":
            raise ValueError("one-pass tiles do not fit in VMEM")
        else:
            path = None
    if path in (None, "twopass"):
        picked = pick_streamed(lambda a, b: _est_twopass(a, b, d, xi, wi))
        if picked is None:
            picked = (sub, 128)
        tm, tv = picked
        path = "twopass"

    # >= 2 row blocks whenever possible so v7x's two TensorCores both get work
    # (the row axis is "parallel"); near-free on single-core v5e/v6e.
    if M > sub and _round_up(M, tm) // tm < 2:
        tm = max(sub, _round_up(-(-M // 2), sub))

    Mp = _round_up(M, tm)
    x2d = x.reshape(M, d)
    if Mp != M:
        x2d = jnp.pad(x2d, ((0, Mp - M), (0, 0)))   # padded rows sliced off below

    if path == "resident":
        out = _resident_call(x2d, weight, b2d, tm, out_dtype, vmem_limit,
                             single_buffer=(w_bufs == 1))
    elif path == "onepass":
        out = _onepass_call(x2d, weight, b2d, tm, tv, out_dtype, vmem_limit)
    else:
        out = _twopass_call(x2d, weight, b2d, tm, tv, out_dtype, vmem_limit)

    if Mp != M:
        out = out[:M]
    if Vp != V:
        out = out[:, :V]
    return out.reshape(B, S, V)


# ---------------------------------------------------------------------------
# reference + self-test
# ---------------------------------------------------------------------------

def _reference(x, weight, bias):
    logits = jnp.einsum("bsd,vd->bsv", x, weight,
                        precision=lax.Precision.HIGHEST) + bias
    return jax.nn.log_softmax(logits, axis=-1)


if __name__ == "__main__":
    key = jax.random.PRNGKey(0)
    ks = jax.random.split(key, 9)

    # --- Test 1: small module-consistent shapes, automatic path selection
    #     (resident weight, >=2 row blocks for megacore). ---
    B, S, d_model, vocab = 2, 8, 32, 128
    bound = 1.0 / math.sqrt(d_model)
    x = jax.random.normal(ks[0], (B, S, d_model), jnp.float32)
    w = jax.random.uniform(ks[1], (vocab, d_model), jnp.float32, -bound, bound)
    b = jax.random.uniform(ks[2], (vocab,), jnp.float32, -bound, bound)

    f1 = jax.jit(lambda a, bb, cc: linear_log_softmax(a, bb, cc))
    out = jax.block_until_ready(f1(x, w, b))
    ref = _reference(x, w, b)
    assert out.shape == (B, S, vocab) and out.dtype == jnp.float32
    assert jnp.allclose(out, ref, atol=1e-4, rtol=1e-4), "resident path mismatch"

    # --- Test 2: force the single-pass vocab-streamed path (online softmax,
    #     resident output slab); vocab not a multiple of 128 and batch*seq not
    #     a multiple of the row tile, so both padding paths are exercised. ---
    B2, S2, d2, V2 = 2, 7, 64, 500
    bound2 = 1.0 / math.sqrt(d2)
    x2 = jax.random.normal(ks[3], (B2, S2, d2), jnp.float32)
    w2 = jax.random.uniform(ks[4], (V2, d2), jnp.float32, -bound2, bound2)
    b2 = jax.random.uniform(ks[5], (V2,), jnp.float32, -bound2, bound2)

    f2 = jax.jit(lambda a, bb, cc: linear_log_softmax(
        a, bb, cc, force_path="onepass", row_tile=8, vocab_tile=128))
    out2 = jax.block_until_ready(f2(x2, w2, b2))
    ref2 = _reference(x2, w2, b2)
    assert out2.shape == (B2, S2, V2)
    assert jnp.allclose(out2, ref2, atol=1e-4, rtol=1e-4), "one-pass path mismatch"

    # --- Test 3: force the huge-vocab two-call path (raw logits cached in HBM,
    #     elementwise normalize pass aliased in place, no second matmul). ---
    B3, S3, d3, V3 = 2, 8, 32, 384
    bound3 = 1.0 / math.sqrt(d3)
    x3 = jax.random.normal(ks[6], (B3, S3, d3), jnp.float32)
    w3 = jax.random.uniform(ks[7], (V3, d3), jnp.float32, -bound3, bound3)
    b3 = jax.random.uniform(ks[8], (V3,), jnp.float32, -bound3, bound3)

    f3 = jax.jit(lambda a, bb, cc: linear_log_softmax(
        a, bb, cc, force_path="twopass", row_tile=8, vocab_tile=128))
    out3 = jax.block_until_ready(f3(x3, w3, b3))
    ref3 = _reference(x3, w3, b3)
    assert out3.shape == (B3, S3, V3)
    assert jnp.allclose(out3, ref3, atol=1e-4, rtol=1e-4), "two-pass path mismatch"

    print("KERNEL_OK")
</pallas_src>

<mosaic_0001>
module attributes {stable_mosaic.version = 11 : i64} {
  func.func @_fused_kernel(%arg0: i32, %arg1: memref<8x32xf32, #tpu.memory_space<vmem>>, %arg2: memref<128x32xf32, #tpu.memory_space<vmem>>, %arg3: memref<1x128xf32, #tpu.memory_space<vmem>>, %arg4: memref<8x128xf32, #tpu.memory_space<vmem>>) attributes {dimension_semantics = [#tpu.dimension_semantics<parallel>], iteration_bounds = array<i64: 2>, scalar_prefetch = 0 : i64, scratch_operands = 0 : i64, tpu.core_type = #tpu.core_type<tc>, window_params = [{transform_indices = @transform_0, window_bounds = array<i64: 8, 32>}, {pipeline_mode = #tpu.pipeline_mode<synchronous>, transform_indices = @transform_1, window_bounds = array<i64: 128, 32>}, {pipeline_mode = #tpu.pipeline_mode<synchronous>, transform_indices = @transform_2, window_bounds = array<i64: 1, 128>}, {transform_indices = @transform_3, window_bounds = array<i64: 8, 128>}]} {
    %c0 = arith.constant 0 : index
    %c0_0 = arith.constant 0 : index
    %0 = vector.load %arg1[%c0, %c0_0] : memref<8x32xf32, #tpu.memory_space<vmem>>, vector<8x32xf32>
    %c0_1 = arith.constant 0 : index
    %c0_2 = arith.constant 0 : index
    %1 = vector.load %arg2[%c0_1, %c0_2] : memref<128x32xf32, #tpu.memory_space<vmem>>, vector<128x32xf32>
    %cst = arith.constant dense<0.000000e+00> : vector<8x128xf32>
    %2 = tpu.matmul %0, %1, %cst {dimension_numbers = #tpu.dot_dimension_numbers<[1], [1], [0], [0], [0, 0, 1, 0], [], []>} : vector<8x32xf32>, vector<128x32xf32>, vector<8x128xf32> -> vector<8x128xf32>
    %c0_3 = arith.constant 0 : index
    %c0_4 = arith.constant 0 : index
    %3 = vector.load %arg3[%c0_3, %c0_4] : memref<1x128xf32, #tpu.memory_space<vmem>>, vector<1x128xf32>
    %4 = vector.broadcast %3 : vector<1x128xf32> to vector<8x128xf32>
    %5 = arith.addf %2, %4 : vector<8x128xf32>
    %cst_5 = arith.constant dense<0xFF800000> : vector<8xf32>
    %6 = vector.multi_reduction <maximumf>, %5, %cst_5 [1] : vector<8x128xf32> to vector<8xf32>
    %7 = vector.shape_cast %6 : vector<8xf32> to vector<8x1xf32>
    %8 = vector.broadcast %7 : vector<8x1xf32> to vector<8x128xf32>
    %9 = arith.subf %5, %8 : vector<8x128xf32>
    %10 = math.exp %9 : vector<8x128xf32>
    %cst_6 = arith.constant dense<0.000000e+00> : vector<8xf32>
    %11 = vector.multi_reduction <add>, %10, %cst_6 [1] : vector<8x128xf32> to vector<8xf32>
    %12 = vector.shape_cast %11 : vector<8xf32> to vector<8x1xf32>
    %13 = math.log %12 : vector<8x1xf32>
    %14 = vector.broadcast %13 : vector<8x1xf32> to vector<8x128xf32>
    %15 = arith.subf %9, %14 : vector<8x128xf32>
    %c0_7 = arith.constant 0 : index
    %c0_8 = arith.constant 0 : index
    %16 = vector.load %arg4[%c0_7, %c0_8] : memref<8x128xf32, #tpu.memory_space<vmem>>, vector<8x128xf32>
    tpu.vector_store %arg4[%c0_7, %c0_8], %15 {strides = array<i32>} : memref<8x128xf32, #tpu.memory_space<vmem>>, vector<8x128xf32>,
    return
  }
  func.func @transform_0(%arg0: i32) -> (i32, i32) {
    %c0_i32 = arith.constant 0 : i32
    %c0_i32_0 = arith.constant 0 : i32
    return %arg0, %c0_i32 : i32, i32
  }
  func.func @transform_1(%arg0: i32) -> (i32, i32) {
    %c0_i32 = arith.constant 0 : i32
    %c0_i32_0 = arith.constant 0 : i32
    %c0_i32_1 = arith.constant 0 : i32
    return %c0_i32, %c0_i32_0 : i32, i32
  }
  func.func @transform_2(%arg0: i32) -> (i32, i32) {
    %c0_i32 = arith.constant 0 : i32
    %c0_i32_0 = arith.constant 0 : i32
    %c0_i32_1 = arith.constant 0 : i32
    return %c0_i32, %c0_i32_0 : i32, i32
  }
  func.func @transform_3(%arg0: i32) -> (i32, i32) {
    %c0_i32 = arith.constant 0 : i32
    %c0_i32_0 = arith.constant 0 : i32
    return %arg0, %c0_i32 : i32, i32
  }
}

</mosaic_0001>

<bundles_post_ra>
// kernel: _lambda_.1
= control target key start
LH: loop header
LB: loop body
LE: loop exit
PB: predicated region body
PF: predicated region fallthrough
CT: control target
= control target key end

     0   :  { %8 = vsyncpa [#allocation3], 0  ;;  %s816_s0 = inlined_call_operand.vmem [shape: f32[16,32], index: 0, kind: input, shape index: {}]   ;;  %s817_s1 = inlined_call_operand.vmem [shape: f32[128,32], index: 1, kind: input, shape index: {}]   ;;  %s818_s2 = inlined_call_operand.vmem [shape: f32[1,128], index: 2, kind: input, shape index: {}]   ;;  %s819_s3 = inlined_call_operand.hbm [shape: f32[16,128], index: 3, kind: output, shape index: {}]  }
   0x1   :  { %10 = vsyncpa [#allocation3 + $0x1], 0  ;;  %s642_s12 = smov 0   ;;  %s644_s13 = smov 0  }
   0x2   :  { %s646_s14 = smov 0   ;;  %s648_s15 = smov 0  }
   0x3 LB: > { %s663_s16 = sadd.s32 4294967295, %s616_s15   ;;  %s396_s17 = sadd.s32 4294967294, %s616_s15   ;;  %s616_s15 = sphi %s648_s15, %s827_s15   ;;  %s612_s14 = sphi %s646_s14, %s826_s14   ;;  %s608_s13 = sphi %s644_s13, %s825_s13   ;;  %s604_s12 = sphi %s642_s12, %s824_s12  }
   0x4   : > { %s667_s18 = sadd.s32 1, %s616_s15   ;;  %s91_s19 = sadd.s32 1, %s612_s14 }
   0x5   : > { %s88_s20 = ssub.s32 %s616_s15, %s667_s18  ;;  %p101_p0 = scmp.ne.s32.totalorder %s612_s14, %s608_s13 }
   0x6   : > { %p89_p1 = scmp.eq.s32.totalorder %s88_s20, 0  ;;  %p102_p2 = scmp.eq.s32.totalorder %s663_s16, 1 }
   0x7   : > { %p107_p3 = scmp.ne.s32.totalorder %s608_s13, %s604_s12  ;;  %p108_p4 = scmp.eq.s32.totalorder %s396_s17, 1 }
   0x8   : > { %s678_s21 = scalar_select %p89_p1, %s612_s14, %s91_s19  }
   0x9   : > { %p680_p5 = por %p102_p2, %p101_p0  ;;  %p684_p6 = por %p108_p4, %p107_p3 }
   0xa   : > { %p399_p7 = scmp.ge.s32.totalorder %s616_s15, 1  ;;  %p139_p8 = scmp.lt.s32.totalorder %s616_s15, 3 }
   0xc   : > { %p140_p9 = pnand %p399_p7, %p139_p8 }
   0xd   : > { %v167_v0 = vld [vmem:[%s817_s1] sm:$0xff] (!%p140_p9)  ;;  %v168_v1 = vld [vmem:[%s817_s1 + $0x8] sm:$0xff] (!%p140_p9)  ;;  %vm190_vm0 = vcmask (!%p140_p9), 261120   ;;  %v618_v2 = vmov (!%p140_p9), 0.0|0.0   ;;  %vm619_vm2 = vmmov (!%p140_p9), 0   ;;  %v620_v5 = vmov (!%p140_p9), 0.0  }
   0xe   : > { %143 = sbr.rel (%p140_p9) target bundleno = 621 (0x26d), region = 32  ;;  %476 = vmatprep.subr.bf16.mxu0 (!%p140_p9), %v618_v2  ;;  %v477_v3 = vpack.c.bf16 (!%p140_p9), %v168_v1, %v167_v0  ;;  %vm698_vm1 = vmpackc.low (!%p140_p9), %vm190_vm0, %vm190_vm0  ;;  %473 = vmatprep.mubr.msk.f32.mxu0 (!%p140_p9), %vm619_vm2, %v620_v5  ;;  %v169_v6 = vld [vmem:[%s817_s1 + $0x10] sm:$0xff] (!%p140_p9)  ;;  %v170_v7 = vld [vmem:[%s817_s1 + $0x18] sm:$0xff] (!%p140_p9)  ;;  %p162_p10 = scmp.lt.s32.totalorder (!%p140_p9), %s663_s16, 1 }
   0xf   : > { %v481_v8 = vpack.c.bf16 (!%p140_p9), %v170_v7, %v169_v6  ;;  %v171_v9 = vld [vmem:[%s817_s1 + $0x20] sm:$0xff] (!%p140_p9)  ;;  %v172_v10 = vld [vmem:[%s817_s1 + $0x28] sm:$0xff] (!%p140_p9)  ;;  %v173_v12 = vld [vmem:[%s817_s1 + $0x30] sm:$0xff] (!%p140_p9)  ;;  %s159_s27 = sand.u32 (!%p140_p9), 1, %s608_s13   ;;  %s421_s29 = sshll.u32 (!%p140_p9), %s663_s16, 7 }
  0x10   : > { %479 = vmatpush3.bf16.xpose.msk.msra.mxu0 (!%p140_p9), %vm698_vm1, %v477_v3  ;;  %v485_v11 = vpack.c.bf16 (!%p140_p9), %v172_v10, %v171_v9  ;;  %v174_v13 = vld [vmem:[%s817_s1 + $0x38] sm:$0xff] (!%p140_p9)  ;;  %v175_v15 = vld [vmem:[%s817_s1 + $0x40] sm:$0xff] (!%p140_p9)  ;;  %v176_v16 = vld [vmem:[%s817_s1 + $0x48] sm:$0xff] (!%p140_p9)  ;;  %s400_s28 = sshll.u32 (!%p140_p9), %s159_s27, 3  ;;  %s774_s7 = scalar_lea.hbm (!%p140_p9), %s819_s3, %s421_s29 }
  0x11   : > { %480 = vmatprep.subr.bf16.mxu0 (!%p140_p9), %v618_v2  ;;  %v489_v14 = vpack.c.bf16 (!%p140_p9), %v174_v13, %v173_v12  ;;  %v493_v17 = vpack.c.bf16 (!%p140_p9), %v176_v16, %v175_v15  ;;  %v177_v18 = vld [vmem:[%s817_s1 + $0x50] sm:$0xff] (!%p140_p9)  ;;  %v178_v19 = vld [vmem:[%s817_s1 + $0x58] sm:$0xff] (!%p140_p9)  ;;  %v179_v21 = vld [vmem:[%s817_s1 + $0x60] sm:$0xff] (!%p140_p9)  ;;  %s161_s30 = scalar_lea.vmem (!%p140_p9), [#allocation2], %s400_s28  ;;  %s324_s8 = scalar_lea.sflag (!%p140_p9), [#allocation3], %s159_s27 }
  0x12   : > { %v497_v20 = vpack.c.bf16 (!%p140_p9), %v178_v19, %v177_v18  ;;  %v180_v22 = vld [vmem:[%s817_s1 + $0x68] sm:$0xff] (!%p140_p9)  ;;  %v181_v24 = vld [vmem:[%s817_s1 + $0x70] sm:$0xff] (!%p140_p9)  ;;  %v182_v25 = vld [vmem:[%s817_s1 + $0x78] sm:$0xff] (!%p140_p9)  ;;  %s337_s4 = sshll.u32 (!%p140_p9), %s161_s30, 4  ;;  %s776_s4 = int_to_ptr.vmem [resolvable:$true] %s337_s4 }
  0x13   : > { %v501_v23 = vpack.c.bf16 (!%p140_p9), %v180_v22, %v179_v21  ;;  %v505_v26 = vpack.c.bf16 (!%p140_p9), %v182_v25, %v181_v24  ;;  %v402_v28 = vld [vmem:[%s818_s2] ss:$0 sm:$0xff] (!%p140_p9)  ;;  %s554_s9 = scalar_lea.vmem (!%p140_p9), %s776_s4, 128 }
  0x14   : > { %p555_p11 = scmp.ne.s32.totalorder (!%p140_p9), %s776_s4, %s554_s9 }
  0x15   : > { %s163_s11 = scalar_select %p162_p10, %s663_s16, 1 }
  0x16   : > { %p556_p12 = pnand %p555_p11, %p680_p5  ;;  %s621_s16 = smov [#allocation2]  }
  0x17   : > { %s401_s17 = sshll.u32 %s163_s11, 3  ;;  %s558_s10 = sshll.u32 %s621_s16, 4  ;;  %s559_s10 = int_to_ptr.vmem [resolvable:$false] %s558_s10 }
  0x18   : > { %483 = vmatpush3.bf16.xpose.msk.msra.mxu0 %vm698_vm1, %v481_v8  ;;  %s165_s24 = scalar_lea.vmem %s816_s0, %s401_s17  ;;  %p557_p13 = pneg %p556_p12 }
  0x19   : > { %484 = vmatprep.subr.bf16.mxu0 %v618_v2  ;;  %v166_v27 = vld [vmem:[%s165_s24] sm:$0xff]  ;;  %s560_s11 = scalar_lea.vmem %s559_s10, 256  ;;  %p561_p0 = scmp.lt.s32.totalorder %s776_s4, %s559_s10 }
  0x1a   : > { %p562_p1 = scmp.lt.s32.totalorder %s560_s11, %s554_s9 }
  0x1c   : > { %p563_p2 = por %p562_p1, %p561_p0 }
  0x1e   : > { %p564_p3 = pnand %p563_p2, %p557_p13 }
  0x20   : > { %487 = vmatpush3.bf16.xpose.msk.msra.mxu0 %vm698_vm1, %v485_v11 }
  0x21   : > { %488 = vmatprep.subr.bf16.mxu0 %v618_v2 }
  0x28   : > { %491 = vmatpush3.bf16.xpose.msk.msra.mxu0 %vm698_vm1, %v489_v14 }
  0x29   : > { %492 = vmatprep.subr.bf16.mxu0 %v618_v2 }
  0x30   : > { %495 = vmatpush3.bf16.xpose.msk.msra.mxu0 %vm698_vm1, %v493_v17 }
  0x31   : > { %496 = vmatprep.subr.bf16.mxu0 %v618_v2 }
  0x38   : > { %499 = vmatpush3.bf16.xpose.msk.msra.mxu0 %vm698_vm1, %v497_v20 }
  0x39   : > { %500 = vmatprep.subr.bf16.mxu0 %v618_v2 }
  0x40   : > { %503 = vmatpush3.bf16.xpose.msk.msra.mxu0 %vm698_vm1, %v501_v23 }
  0x41   : > { %504 = vmatprep.subr.bf16.mxu0 %v618_v2 }
  0x48   : > { %507 = vmatpush3.bf16.xpose.msk.msra.mxu0 %vm698_vm1, %v505_v26 }
  0x4f   : > { %474 = vmatmul.mubr.msk.f32.vlgmr.msra.gmra.mrb[0].mxu0 %vm190_vm0, %v166_v27 }
 0x122   : > { %v308_v29 = vpop.f32.mrb[0].mxu0 }
 0x123   : > { %v309_v30 = vadd.f32 %v402_v28, %v308_v29  ;;  %v475_v31 = vpop.f32.mrb[1].mxu0 }
 0x125   : > { %312 = vmax.xlane.f32.xlu0 %v309_v30 }
 0x1b2   : > { %v313_v32 = vpop.xlane.xlu0 %312 }
 0x1b3   : > { %v314_v33 = vsub.f32 %v309_v30, %v313_v32 }
 0x1b5   : > { %v315_v34 = vmul.f32 1.442695, %v314_v33 }
 0x1b7   : > { %550 = vpow2.f32 %v315_v34 }
 0x1c1   : > { %v551_v35 = vpop.eup %550 }
 0x1c2   : > { %317 = vadd.xlane.f32.xlu0 %v551_v35 }
 0x24f   : > { %v318_v36 = vpop.xlane.xlu0 %317 }
 0x250   : > { %552 = vlog2.f32 %v318_v36 }
 0x25a   : > { %v553_v37 = vpop.eup %552 }
 0x25b   : > { %v320_v38 = vmul.f32 0.6931472, %v553_v37 }
 0x25d   : > { %v321_v39 = vsub.f32 %v314_v33, %v320_v38 }
 0x25f   : > { %322 = vst [vmem:[%s161_s30] sm:$0xff] %v321_v39 }
 0x260   : > { %567 = shalt.err (!%p564_p3)
}
 0x261   : > { %s568_s17 = scalar_lea.hbm %s774_s7, 128  ;;  %s572_s24 = scalar_lea.hbm %s819_s3, 256 }
 0x262   : > { %p569_p4 = scmp.ne.s32.totalorder %s774_s7, %s568_s17  ;;  %p573_p9 = scmp.lt.u32.totalorder %s774_s7, %s819_s3 }
 0x263   : > { %p574_p10 = scmp.lt.u32.totalorder %s572_s24, %s568_s17  ;;  %p576_p12 = scmp.lt.u32.totalorder %s568_s17, %s774_s7 }
 0x264   : > { %p570_p7 = pnand %p569_p4, %p680_p5 }
 0x265   : > { %p575_p11 = por %p574_p10, %p573_p9 }
 0x266   : > { %p571_p8 = pneg %p570_p7 }
 0x267   : > { %p577_p13 = por %p576_p12, %p575_p11 }
 0x269   : > { %p578_p0 = pnand %p577_p13, %p571_p8 }
 0x26b   : > { %581 = shalt.err (!%p578_p0)
}
 0x26c   : > { %508 = dma.vmem_to_hbm [thread:$0]  (%p680_p5), %s776_s4, 128, %s774_s7, %s324_s8  }
 0x26d PF: > { %p514_p1 = scmp.ge.s32.totalorder %s616_s15, 2  ;;  %s349_s27 = sand.u32 1, %s604_s12  }
 0x26e   : > { %s350_s28 = scalar_lea.sflag [#allocation3], %s349_s27 }
 0x26f   : > { %p511_p2 = pnand %p514_p1, %p684_p6 }
 0x271   : > { %599 = dma.done.wait (!%p511_p2), %s350_s28, 128  }
 0x272   : > { %601 = vsyncadd (!%p511_p2), %s350_s28, 4294967168  ;;  %p13_p3 = scmp.ge.s32.totalorder %s667_s18, 4   ;;  %s824_s12 = smov %s608_s13 }
 0x273   : > { %s825_s13 = smov %s612_s14  ;;  %s826_s14 = smov %s678_s21 }
 0x274   : > { %s827_s15 = smov %s667_s18  ;;  %15 = sbr.rel (!%p13_p3) target bundleno = 3 (0x3), region = 67 }
 0x27b   :  { %355 = vsyncpa [#allocation3], 1 }
 0x27c   :  { %357 = vsyncpa [#allocation3 + $0x1], 1 }

</bundles_post_ra>
